<compile_context>
chip_gen: v6e
topology: v6e:2x2x1
jax: 0.10.0
libtpu: 0.0.40
codegen_flags: <defaults>
</compile_context>

<pallas_src>
import functools

import jax
import jax.numpy as jnp
from jax import lax
from jax.experimental import pallas as pl
from jax.experimental.pallas import tpu as pltpu


def _round_up(x, m):
    return (x + m - 1) // m * m


def dense_kernel(x_ref, w_ref, b_ref, o_ref, acc_ref):
    # x_ref : (tm, tk)  input tile
    # w_ref : (tn, tk)  weight tile, kept in PyTorch (out, in) layout
    # b_ref : (1,  tn)  bias tile (broadcast over tm)
    # o_ref : (tm, tn)  output tile
    # acc_ref: (tm, tn) f32 accumulator, lives across the K grid axis
    k = pl.program_id(2)

    @pl.when(k == 0)
    def _():
        acc_ref[...] = jnp.zeros_like(acc_ref)

    # Contract the shared K axis directly on the (out, in) weight layout:
    # x (tm,tk) . w^T (tk,tn) without ever materializing weight.T in HBM.
    acc_ref[...] += lax.dot_general(
        x_ref[...], w_ref[...],
        dimension_numbers=(((1,), (1,)), ((), ())),
        preferred_element_type=jnp.float32)

    @pl.when(k == pl.num_programs(2) - 1)
    def _():
        o_ref[...] = (acc_ref[...] + b_ref[...].astype(jnp.float32)).astype(o_ref.dtype)


@functools.partial(jax.jit, static_argnames=("block_m", "block_n", "block_k"))
def dense_forward(x, weight, bias=None, *, block_m=None, block_n=None, block_k=None):
    """x: (..., in_features); weight: (out, in); bias: (out,) -> (..., out)."""
    orig_shape = x.shape
    K = orig_shape[-1]
    x2 = x.reshape(-1, K)
    M = x2.shape[0]
    N, K2 = weight.shape
    assert K == K2, "in_features mismatch"

    if bias is None:
        bias = jnp.zeros((N,), dtype=x.dtype)

    # MXU-sized, VMEM-budgeted tiles (adaptive so small demo shapes still work).
    tm = block_m or min(_round_up(M, 8), 256)
    tn = block_n or min(_round_up(N, 128), 512)
    tk = block_k or min(_round_up(K, 128), 512)

    Mp, Np, Kp = _round_up(M, tm), _round_up(N, tn), _round_up(K, tk)

    # Zero-pad so every tile is full and the output last dim is 128-aligned
    # (lane-dense stores). Zero pads contribute nothing to the contraction.
    x_p = jnp.pad(x2, ((0, Mp - M), (0, Kp - K))) if (Mp != M or Kp != K) else x2
    w_p = (jnp.pad(weight, ((0, Np - N), (0, Kp - K)))
           if (Np != N or Kp != K) else weight)
    b_p = (jnp.pad(bias, (0, Np - N)) if Np != N else bias).reshape(1, Np)

    grid = (Mp // tm, Np // tn, Kp // tk)

    itemsize = jnp.dtype(x.dtype).itemsize
    cost = pl.CostEstimate(
        flops=2 * M * N * K,
        transcendentals=0,
        bytes_accessed=(Mp * Kp + Np * Kp + Np + Mp * Np) * itemsize,
    )

    out = pl.pallas_call(
        dense_kernel,
        out_shape=jax.ShapeDtypeStruct((Mp, Np), x.dtype),
        grid_spec=pltpu.PrefetchScalarGridSpec(
            num_scalar_prefetch=0,
            grid=grid,
            in_specs=[
                pl.BlockSpec((tm, tk), lambda i, j, k: (i, k)),  # x tile
                pl.BlockSpec((tn, tk), lambda i, j, k: (j, k)),  # weight tile
                pl.BlockSpec((1, tn), lambda i, j, k: (0, j)),   # bias tile
            ],
            out_specs=pl.BlockSpec((tm, tn), lambda i, j, k: (i, j)),
            scratch_shapes=[pltpu.VMEM((tm, tn), jnp.float32)],
        ),
        compiler_params=pltpu.CompilerParams(
            dimension_semantics=("parallel", "parallel", "arbitrary"),
        ),
        cost_estimate=cost,
    )(x_p, w_p, b_p)

    out = out[:M, :N]
    return out.reshape(*orig_shape[:-1], N)


def init_dense_params(key, in_features, out_features, dtype=jnp.float32):
    """Deterministic re-implementation of Dense.reset_parameters()."""
    kw, _ = jax.random.split(key)
    if in_features == out_features:
        w = jax.nn.initializers.orthogonal()(kw, (out_features, in_features), dtype)
    else:
        limit = (1.0 / in_features) ** 0.5 * (3.0 ** 0.5)
        w = jax.random.uniform(
            kw, (out_features, in_features), dtype, minval=-limit, maxval=limit
        )
    # init.uniform_(bias, -0, 0) -> all zeros
    b = jnp.zeros((out_features,), dtype)
    return w, b


if __name__ == "__main__":
    key = jax.random.PRNGKey(0)
    k_x, k_x2, k_p = jax.random.split(key, 3)

    batch, in_features, out_features = 8, 32, 64

    x = jax.random.normal(k_x, (batch, in_features), jnp.float32)
    weight, bias = init_dense_params(k_p, in_features, out_features)

    out = dense_forward(x, weight, bias)
    out = jax.block_until_ready(out)

    ref = x @ weight.T + bias
    assert out.shape == (batch, out_features)
    assert jnp.allclose(out, ref, atol=1e-5, rtol=1e-5)

    # Also exercise the padded-tail path (batch not a multiple of the tile).
    x_tail = jax.random.normal(k_x2, (5, in_features), jnp.float32)
    out_tail = jax.block_until_ready(dense_forward(x_tail, weight, bias))
    ref_tail = x_tail @ weight.T + bias
    assert out_tail.shape == (5, out_features)
    assert jnp.allclose(out_tail, ref_tail, atol=1e-5, rtol=1e-5)

    print("KERNEL_OK")
</pallas_src>

<mosaic_0001>
module attributes {stable_mosaic.version = 11 : i64} {
  func.func @dense_kernel(%arg0: i32, %arg1: i32, %arg2: i32, %arg3: memref<8x128xf32, #tpu.memory_space<vmem>>, %arg4: memref<128x128xf32, #tpu.memory_space<vmem>>, %arg5: memref<1x128xf32, #tpu.memory_space<vmem>>, %arg6: memref<8x128xf32, #tpu.memory_space<vmem>>, %arg7: memref<8x128xf32, #tpu.memory_space<vmem>>) attributes {dimension_semantics = [#tpu.dimension_semantics<parallel>, #tpu.dimension_semantics<parallel>, #tpu.dimension_semantics<arbitrary>], iteration_bounds = array<i64: 1, 1, 1>, scalar_prefetch = 0 : i64, scratch_operands = 1 : i64, tpu.core_type = #tpu.core_type<tc>, window_params = [{transform_indices = @transform_0, window_bounds = array<i64: 8, 128>}, {transform_indices = @transform_1, window_bounds = array<i64: 128, 128>}, {transform_indices = @transform_2, window_bounds = array<i64: 1, 128>}, {transform_indices = @transform_3, window_bounds = array<i64: 8, 128>}]} {
    %c0_i32 = arith.constant 0 : i32
    %0 = arith.cmpi eq, %arg2, %c0_i32 : i32
    %1 = arith.extui %0 : i1 to i32
    %c0_i32_0 = arith.constant 0 : i32
    %2 = arith.cmpi ne, %1, %c0_i32_0 : i32
    scf.if %2 {
      %cst_10 = arith.constant 0.000000e+00 : f32
      %12 = vector.broadcast %cst_10 : f32 to vector<8x128xf32>
      %c0_11 = arith.constant 0 : index
      %c0_12 = arith.constant 0 : index
      %13 = vector.load %arg7[%c0_11, %c0_12] : memref<8x128xf32, #tpu.memory_space<vmem>>, vector<8x128xf32>
      tpu.vector_store %arg7[%c0_11, %c0_12], %12 {strides = array<i32>} : memref<8x128xf32, #tpu.memory_space<vmem>>, vector<8x128xf32>,
    } else {
    }
    %c0 = arith.constant 0 : index
    %c0_1 = arith.constant 0 : index
    %3 = vector.load %arg7[%c0, %c0_1] : memref<8x128xf32, #tpu.memory_space<vmem>>, vector<8x128xf32>
    %c0_2 = arith.constant 0 : index
    %c0_3 = arith.constant 0 : index
    %4 = vector.load %arg3[%c0_2, %c0_3] : memref<8x128xf32, #tpu.memory_space<vmem>>, vector<8x128xf32>
    %c0_4 = arith.constant 0 : index
    %c0_5 = arith.constant 0 : index
    %5 = vector.load %arg4[%c0_4, %c0_5] : memref<128x128xf32, #tpu.memory_space<vmem>>, vector<128x128xf32>
    %cst = arith.constant dense<0.000000e+00> : vector<8x128xf32>
    %6 = tpu.matmul %4, %5, %cst {dimension_numbers = #tpu.dot_dimension_numbers<[1], [1], [0], [0], [0, 0, 1, 0], [], []>} : vector<8x128xf32>, vector<128x128xf32>, vector<8x128xf32> -> vector<8x128xf32>
    %7 = arith.addf %3, %6 : vector<8x128xf32>
    %c0_6 = arith.constant 0 : index
    %c0_7 = arith.constant 0 : index
    %8 = vector.load %arg7[%c0_6, %c0_7] : memref<8x128xf32, #tpu.memory_space<vmem>>, vector<8x128xf32>
    tpu.vector_store %arg7[%c0_6, %c0_7], %7 {strides = array<i32>} : memref<8x128xf32, #tpu.memory_space<vmem>>, vector<8x128xf32>,
    %c0_i32_8 = arith.constant 0 : i32
    %9 = arith.cmpi eq, %arg2, %c0_i32_8 : i32
    %10 = arith.extui %9 : i1 to i32
    %c0_i32_9 = arith.constant 0 : i32
    %11 = arith.cmpi ne, %10, %c0_i32_9 : i32
    scf.if %11 {
      %c0_10 = arith.constant 0 : index
      %c0_11 = arith.constant 0 : index
      %12 = vector.load %arg7[%c0_10, %c0_11] : memref<8x128xf32, #tpu.memory_space<vmem>>, vector<8x128xf32>
      %c0_12 = arith.constant 0 : index
      %c0_13 = arith.constant 0 : index
      %13 = vector.load %arg5[%c0_12, %c0_13] : memref<1x128xf32, #tpu.memory_space<vmem>>, vector<1x128xf32>
      %14 = vector.broadcast %13 : vector<1x128xf32> to vector<8x128xf32>
      %15 = arith.addf %12, %14 : vector<8x128xf32>
      %c0_14 = arith.constant 0 : index
      %c0_15 = arith.constant 0 : index
      %16 = vector.load %arg6[%c0_14, %c0_15] : memref<8x128xf32, #tpu.memory_space<vmem>>, vector<8x128xf32>
      tpu.vector_store %arg6[%c0_14, %c0_15], %15 {strides = array<i32>} : memref<8x128xf32, #tpu.memory_space<vmem>>, vector<8x128xf32>,
    } else {
    }
    return
  }
  func.func @transform_0(%arg0: i32, %arg1: i32, %arg2: i32) -> (i32, i32) {
    %c0_i32 = arith.constant 0 : i32
    return %arg0, %arg2 : i32, i32
  }
  func.func @transform_1(%arg0: i32, %arg1: i32, %arg2: i32) -> (i32, i32) {
    %c0_i32 = arith.constant 0 : i32
    return %arg1, %arg2 : i32, i32
  }
  func.func @transform_2(%arg0: i32, %arg1: i32, %arg2: i32) -> (i32, i32) {
    %c0_i32 = arith.constant 0 : i32
    %c0_i32_0 = arith.constant 0 : i32
    return %c0_i32, %arg1 : i32, i32
  }
  func.func @transform_3(%arg0: i32, %arg1: i32, %arg2: i32) -> (i32, i32) {
    %c0_i32 = arith.constant 0 : i32
    return %arg0, %arg1 : i32, i32
  }
}

</mosaic_0001>

<bundles_post_ra>
// kernel: dense_forward.1
= control target key start
LH: loop header
LB: loop body
LE: loop exit
PB: predicated region body
PF: predicated region fallthrough
CT: control target
= control target key end

     0   :  { %v215_v1 = vmov 0.0   ;;  %vm216_vm0 = vmmov 0   ;;  %s295_s0 = inlined_call_operand.vmem [shape: f32[8,128], index: 0, kind: input, shape index: {}]   ;;  %s296_s1 = inlined_call_operand.vmem [shape: f32[128,128], index: 1, kind: input, shape index: {}]   ;;  %s297_s2 = inlined_call_operand.vmem [shape: f32[1,128], index: 2, kind: input, shape index: {}]   ;;  %s298_s3 = inlined_call_operand.hbm [shape: f32[8,128], index: 3, kind: output, shape index: {}]  }
   0x1   :  { %v37_v0 = vld [vmem:[%s296_s1 + $0x78] sm:$0xff]  ;;  %155 = vmatprep.subr.mxu0 %v215_v1  ;;  %187 = vmatprep.mubr.msk.f32.mxu0 %vm216_vm0, %v215_v1  ;;  %v36_v2 = vld [vmem:[%s296_s1 + $0x70] sm:$0xff] }
   0x2   :  { %156 = vmatpush3.xpose.msra.mxu0 %v37_v0 }
   0x3   :  { %157 = vmatprep.subr.mxu0 %v215_v1 }
   0x4   :  { %8 = vsyncpa [#allocation4], 0  ;;  %v35_v3 = vld [vmem:[%s296_s1 + $0x68] sm:$0xff]  ;;  %v34_v4 = vld [vmem:[%s296_s1 + $0x60] sm:$0xff]  ;;  %s217_s21 = smov [#allocation3]  }
   0x5   :  { %v33_v5 = vld [vmem:[%s296_s1 + $0x58] sm:$0xff]  ;;  %v32_v6 = vld [vmem:[%s296_s1 + $0x50] sm:$0xff]  ;;  %v31_v7 = vld [vmem:[%s296_s1 + $0x48] sm:$0xff]  ;;  %s129_s22 = sshll.u32 %s217_s21, 4  ;;  %s130_s22 = int_to_ptr.vmem [resolvable:$true] %s129_s22 }
   0x6   :  { %158 = vmatpush3.xpose.msra.mxu0 %v36_v2  ;;  %v30_v8 = vld [vmem:[%s296_s1 + $0x40] sm:$0xff]  ;;  %v29_v9 = vld [vmem:[%s296_s1 + $0x38] sm:$0xff]  ;;  %v28_v10 = vld [vmem:[%s296_s1 + $0x30] sm:$0xff]  ;;  %s193_s23 = scalar_lea.vmem %s130_s22, 128  ;;  %p198_p1 = scmp.lt.s32.totalorder %s130_s22, %s130_s22 }
   0x7   :  { %159 = vmatprep.subr.mxu0 %v215_v1  ;;  %v27_v11 = vld [vmem:[%s296_s1 + $0x28] sm:$0xff]  ;;  %v26_v12 = vld [vmem:[%s296_s1 + $0x20] sm:$0xff]  ;;  %v25_v13 = vld [vmem:[%s296_s1 + $0x18] sm:$0xff]  ;;  %p194_p0 = scmp.ne.s32.totalorder %s130_s22, %s193_s23  ;;  %p199_p2 = scmp.lt.s32.totalorder %s193_s23, %s193_s23 }
   0x8   :  { %v24_v14 = vld [vmem:[%s296_s1 + $0x10] sm:$0xff]  ;;  %v23_v15 = vld [vmem:[%s296_s1 + $0x8] sm:$0xff]  ;;  %v22_v16 = vld [vmem:[%s296_s1] sm:$0xff] }
   0x9   :  { %v21_v17 = vld [vmem:[%s295_s0] sm:$0xff]  ;;  %p200_p3 = por %p199_p2, %p198_p1 }
   0xa   :  { %160 = vmatpush3.xpose.msra.mxu0 %v35_v3  ;;  %v137_v18 = vld [vmem:[%s297_s2] ss:$0 sm:$0xff] }
   0xb   :  { %161 = vmatprep.subr.mxu0 %v215_v1  ;;  %p201_p4 = pnand %p200_p3, %p194_p0 }
   0xe   :  { %162 = vmatpush3.xpose.msra.mxu0 %v34_v4 }
   0xf   :  { %163 = vmatprep.subr.mxu0 %v215_v1 }
  0x12   :  { %164 = vmatpush3.xpose.msra.mxu0 %v33_v5 }
  0x13   :  { %165 = vmatprep.subr.mxu0 %v215_v1 }
  0x16   :  { %166 = vmatpush3.xpose.msra.mxu0 %v32_v6 }
  0x17   :  { %167 = vmatprep.subr.mxu0 %v215_v1 }
  0x1a   :  { %168 = vmatpush3.xpose.msra.mxu0 %v31_v7 }
  0x1b   :  { %169 = vmatprep.subr.mxu0 %v215_v1 }
  0x1e   :  { %170 = vmatpush3.xpose.msra.mxu0 %v30_v8 }
  0x1f   :  { %171 = vmatprep.subr.mxu0 %v215_v1 }
  0x22   :  { %172 = vmatpush3.xpose.msra.mxu0 %v29_v9 }
  0x23   :  { %173 = vmatprep.subr.mxu0 %v215_v1 }
  0x26   :  { %174 = vmatpush3.xpose.msra.mxu0 %v28_v10 }
  0x27   :  { %175 = vmatprep.subr.mxu0 %v215_v1 }
  0x2a   :  { %176 = vmatpush3.xpose.msra.mxu0 %v27_v11 }
  0x2b   :  { %177 = vmatprep.subr.mxu0 %v215_v1 }
  0x2e   :  { %178 = vmatpush3.xpose.msra.mxu0 %v26_v12 }
  0x2f   :  { %179 = vmatprep.subr.mxu0 %v215_v1 }
  0x32   :  { %180 = vmatpush3.xpose.msra.mxu0 %v25_v13 }
  0x33   :  { %181 = vmatprep.subr.mxu0 %v215_v1 }
  0x36   :  { %182 = vmatpush3.xpose.msra.mxu0 %v24_v14 }
  0x37   :  { %183 = vmatprep.subr.mxu0 %v215_v1 }
  0x3a   :  { %184 = vmatpush3.xpose.msra.mxu0 %v23_v15 }
  0x3b   :  { %185 = vmatprep.subr.mxu0 %v215_v1 }
  0x3e   :  { %186 = vmatpush3.xpose.msra.mxu0 %v22_v16 }
  0x41   :  { %188 = vmatmul.mubr.f32.vlgmr.msra.gmra.mxu0 %v21_v17 }
 0x101   :  { %v104_v19 = vpop.f32.mrf.mxu0 }
 0x102   :  { %v121_v20 = vadd.f32 %v137_v18, %v104_v19 }
 0x103   :  { %v189_v21 = vpop.f32.mrf.mxu0 }
 0x104   :  { %122 = vst [vmem:[#allocation3] sm:$0xff] %v121_v20 }
 0x105   :  { %204 = shalt.err (!%p201_p4)
}
 0x106   :  { %132 = dma.vmem_to_hbm [thread:$0]  %s130_s22, 128, %s298_s3, [#allocation4]  }
 0x107   :  { %213 = dma.done.wait [#allocation4], 128  }
 0x108   :  { %214 = vsyncadd [#allocation4], 4294967168 }
 0x109   :  { %136 = vsyncpa [#allocation4], 1 }

</bundles_post_ra>
